<compile_context>
chip_gen: v7x
topology: tpu7x:2x2x1
jax: 0.10.0
libtpu: 0.0.40
codegen_flags: <defaults>
</compile_context>

<pallas_src>
import functools

import jax
import jax.numpy as jnp
from jax import lax
from jax.experimental import pallas as pl
from jax.experimental.pallas import tpu as pltpu


def _ceil_to(v, m):
    return ((v + m - 1) // m) * m


# ----------------------------------------------------------------------------
# Fused kernel: Linear -> ReLU -> BatchNorm1d (batch stats) -> Linear per head,
# PyTorch-style softplus on the stddev head. The whole (tiny) problem lives in
# one VMEM block; BatchNorm1d needs the full batch in one block anyway.
# ----------------------------------------------------------------------------
def _fused_decoder_kernel(x_ref, w1_ref, w2_ref, p_ref, *out_refs, hp: int):
    """
    x_ref      : (B, K)            concatenated [z, action] (no lane padding)
    w1_ref     : (K, n_heads*hp)   heads' first-layer weights, lane-concatenated
    w2_ref     : (n_heads, hp, P)  per-head second-layer weights (zero pad row)
    p_ref      : (4, n_heads*hp)   rows: b1, gamma, beta, b2 (b2 of head i lives
                                   in lanes [i*hp, i*hp+P))
    out_refs[i]: (B, P)            head 0 = mean, head 1 (if present) = softplus
                                   stddev
    """
    x = x_ref[...]

    # Layer 1: one MXU push covering every head's hidden lanes.
    h = jnp.dot(x, w1_ref[...], preferred_element_type=jnp.float32) + p_ref[0:1, :]
    h = jnp.maximum(h, 0.0)                                          # ReLU

    # BatchNorm1d, training-mode semantics: batch mean, biased variance,
    # eps=1e-5, then affine gamma/beta. Per-column, so fused heads (and the
    # zero pad column, gamma=beta=0) stay independent.
    mu = jnp.mean(h, axis=0, keepdims=True)
    d = h - mu
    var = jnp.mean(d * d, axis=0, keepdims=True)                     # biased
    y = d * lax.rsqrt(var + 1e-5) * p_ref[1:2, :] + p_ref[2:3, :]

    # Layer 2, per head: static 128-lane slice of y, small (hp, P) matmul, bias.
    for i, o_ref in enumerate(out_refs):
        p_dim = o_ref.shape[1]
        yi = y[:, i * hp:(i + 1) * hp]
        o = (jnp.dot(yi, w2_ref[i], preferred_element_type=jnp.float32)
             + p_ref[3:4, i * hp:i * hp + p_dim])
        if i == 1:
            # PyTorch F.softplus (beta=1, threshold=20): x if x > 20 else
            # log1p(exp(x)), applied to the stddev head only.
            o = jnp.where(o > 20.0, o, jnp.log1p(jnp.exp(jnp.minimum(o, 20.0))))
        o_ref[...] = o.astype(o_ref.dtype)


def _run_fused(x, w1, w2, pvec):
    B, K = x.shape
    n_heads, hp, p_dim = w2.shape
    kernel = functools.partial(_fused_decoder_kernel, hp=hp)
    vmem = pl.BlockSpec(memory_space=pltpu.MemorySpace.VMEM)
    flops = 2 * B * K * w1.shape[1] + n_heads * 2 * B * hp * p_dim
    transcendentals = 2 * B * p_dim if n_heads > 1 else 0            # exp + log1p
    bytes_accessed = 4 * (int(x.size) + int(w1.size) + int(w2.size)
                          + int(pvec.size) + n_heads * B * p_dim)
    cost = pl.CostEstimate(flops=int(flops), transcendentals=int(transcendentals),
                           bytes_accessed=int(bytes_accessed))
    return pl.pallas_call(
        kernel,
        out_shape=tuple(jax.ShapeDtypeStruct((B, p_dim), jnp.float32)
                        for _ in range(n_heads)),
        in_specs=[vmem] * 4,
        out_specs=tuple(vmem for _ in range(n_heads)),
        cost_estimate=cost,
    )(x, w1, w2, pvec)


# ----------------------------------------------------------------------------
# Parameter construction (deterministic), matching the PyTorch module shapes:
#   get_sequential_from_architecture([{'output_dim': 127}], R+A, P)
#     -> Linear(R+A, 127), ReLU, BatchNorm1d(127), Linear(127, P)
# ----------------------------------------------------------------------------
def make_projection_params(key, in_dim, hidden_dim, proj_dim):
    k1, k2, k3, k4 = jax.random.split(key, 4)
    return {
        "w1": jax.random.normal(k1, (in_dim, hidden_dim), jnp.float32) * 0.05,
        "b1": jax.random.normal(k2, (hidden_dim,), jnp.float32) * 0.05,
        "gamma": jnp.ones((hidden_dim,), jnp.float32),   # BatchNorm1d defaults
        "beta": jnp.zeros((hidden_dim,), jnp.float32),
        "w2": jax.random.normal(k3, (hidden_dim, proj_dim), jnp.float32) * 0.05,
        "b2": jax.random.normal(k4, (proj_dim,), jnp.float32) * 0.05,
    }


def pack_decoder_params(heads, projection_dim):
    """ONE-TIME packing of 1 or 2 head parameter sets into kernel operands.

    Call at module init (or whenever params change), not per forward. Head i
    occupies hidden lanes [i*128, i*128+127); the pad column gets gamma=beta=0
    and a zero W2 pad row, so it contributes nothing.
    """
    K, H = heads[0]["w1"].shape
    HP = _ceil_to(H, 128)                       # 127 -> 128 per head
    n_heads = len(heads)
    w1 = jnp.zeros((K, n_heads * HP), jnp.float32)
    w2 = jnp.zeros((n_heads, HP, projection_dim), jnp.float32)
    pvec = jnp.zeros((4, n_heads * HP), jnp.float32)   # rows: b1, gamma, beta, b2
    for i, hd in enumerate(heads):
        c = i * HP
        w1 = w1.at[:, c:c + H].set(hd["w1"])
        w2 = w2.at[i, :H, :].set(hd["w2"])
        pvec = pvec.at[0, c:c + H].set(hd["b1"])
        pvec = pvec.at[1, c:c + H].set(hd["gamma"])
        pvec = pvec.at[2, c:c + H].set(hd["beta"])
        pvec = pvec.at[3, c:c + projection_dim].set(hd["b2"])
    return {"w1": w1, "w2": w2, "p": pvec}


@functools.partial(jax.jit, static_argnames=("learn_scale",))
def action_conditioned_vector_decoder_forward(z_mean, z_stddev, action_mean,
                                              packed, *, learn_scale):
    """Returns (mean, stddev) of independent_multivariate_normal(mean, stddev)."""
    x = jnp.concatenate([z_mean, action_mean], axis=1).astype(jnp.float32)
    outs = _run_fused(x, packed["w1"], packed["w2"], packed["p"])
    mean = outs[0]
    if learn_scale:
        return mean, outs[1]
    # Faithful to the module: scale = z_dist.stddev (module asserts all ones).
    # NOTE: its trailing dim is representation_dim, not projection_dim, exactly
    # as in the PyTorch code path.
    return mean, z_stddev


# ----------------------------------------------------------------------------
# Pure-JAX reference for a correctness check.
# ----------------------------------------------------------------------------
def _proj_net_ref(z, a, p, apply_softplus):
    merged = jnp.concatenate([z, a], axis=1)
    h = jnp.maximum(merged @ p["w1"] + p["b1"], 0.0)
    mu = jnp.mean(h, axis=0, keepdims=True)
    var = jnp.mean((h - mu) ** 2, axis=0, keepdims=True)
    y = (h - mu) / jnp.sqrt(var + 1e-5) * p["gamma"] + p["beta"]
    out = y @ p["w2"] + p["b2"]
    if apply_softplus:
        out = jnp.where(out > 20.0, out, jnp.log1p(jnp.exp(jnp.minimum(out, 20.0))))
    return out


if __name__ == "__main__":
    # Small shapes consistent with the module's forward.
    B = 8                      # batch
    REP_DIM = 32               # representation_dim
    ACT_DIM = 16               # action_representation_dim
    PROJ_DIM = 16              # projection_dim
    HIDDEN = 127               # DEFAULT_PROJECTION_ARCHITECTURE output_dim

    key = jax.random.PRNGKey(0)
    k_z, k_a, k_mean, k_std = jax.random.split(key, 4)

    z_mean = jax.random.normal(k_z, (B, REP_DIM), jnp.float32)       # z_dist.mean
    z_stddev = jnp.ones((B, REP_DIM), jnp.float32)                   # z_dist.stddev
    action_mean = jax.random.normal(k_a, (B, ACT_DIM), jnp.float32)  # extra_context.mean

    mean_params = make_projection_params(k_mean, REP_DIM + ACT_DIM, HIDDEN, PROJ_DIM)
    std_params = make_projection_params(k_std, REP_DIM + ACT_DIM, HIDDEN, PROJ_DIM)

    # One-time "module init" packing: cached, NOT rebuilt per forward call.
    packed_two_head = pack_decoder_params([mean_params, std_params], PROJ_DIM)
    packed_one_head = pack_decoder_params([mean_params], PROJ_DIM)

    # learn_scale=True path (fused 2-head kernel, softplus on scale head).
    mean_out, scale_out = action_conditioned_vector_decoder_forward(
        z_mean, z_stddev, action_mean, packed_two_head, learn_scale=True)
    jax.block_until_ready((mean_out, scale_out))

    mean_ref = _proj_net_ref(z_mean, action_mean, mean_params, False)
    scale_ref = _proj_net_ref(z_mean, action_mean, std_params, True)
    assert mean_out.shape == (B, PROJ_DIM) and scale_out.shape == (B, PROJ_DIM)
    assert jnp.allclose(mean_out, mean_ref, atol=1e-4, rtol=1e-4)
    assert jnp.allclose(scale_out, scale_ref, atol=1e-4, rtol=1e-4)

    # learn_scale=False path (single-head kernel, stddev passthrough).
    mean_out2, scale_out2 = action_conditioned_vector_decoder_forward(
        z_mean, z_stddev, action_mean, packed_one_head, learn_scale=False)
    jax.block_until_ready((mean_out2, scale_out2))
    assert jnp.allclose(mean_out2, mean_ref, atol=1e-4, rtol=1e-4)
    assert jnp.allclose(scale_out2, z_stddev)

    print("KERNEL_OK")
</pallas_src>

<mosaic_0001>
module attributes {stable_mosaic.version = 11 : i64} {
  func.func @_fused_decoder_kernel(%arg0: memref<8x48xf32, #tpu.memory_space<vmem>>, %arg1: memref<48x256xf32, #tpu.memory_space<vmem>>, %arg2: memref<2x128x16xf32, #tpu.memory_space<vmem>>, %arg3: memref<4x256xf32, #tpu.memory_space<vmem>>, %arg4: memref<8x16xf32, #tpu.memory_space<vmem>>, %arg5: memref<8x16xf32, #tpu.memory_space<vmem>>) attributes {dimension_semantics = [], scalar_prefetch = 0 : i64, scratch_operands = 0 : i64, tpu.core_type = #tpu.core_type<tc>} {
    %c0 = arith.constant 0 : index
    %c0_0 = arith.constant 0 : index
    %0 = vector.load %arg0[%c0, %c0_0] : memref<8x48xf32, #tpu.memory_space<vmem>>, vector<8x48xf32>
    %c0_1 = arith.constant 0 : index
    %c0_2 = arith.constant 0 : index
    %1 = vector.load %arg1[%c0_1, %c0_2] : memref<48x256xf32, #tpu.memory_space<vmem>>, vector<48x256xf32>
    %cst = arith.constant dense<0.000000e+00> : vector<8x256xf32>
    %2 = tpu.matmul %0, %1, %cst {dimension_numbers = #tpu.dot_dimension_numbers<[1], [0], [0], [1], [0, 0, 1, 1], [], []>} : vector<8x48xf32>, vector<48x256xf32>, vector<8x256xf32> -> vector<8x256xf32>
    %c0_3 = arith.constant 0 : index
    %c0_4 = arith.constant 0 : index
    %3 = vector.load %arg3[%c0_3, %c0_4] : memref<4x256xf32, #tpu.memory_space<vmem>>, vector<1x256xf32>
    %4 = vector.broadcast %3 : vector<1x256xf32> to vector<8x256xf32>
    %5 = arith.addf %2, %4 : vector<8x256xf32>
    %cst_5 = arith.constant 0.000000e+00 : f32
    %6 = vector.broadcast %cst_5 : f32 to vector<8x256xf32>
    %7 = arith.maximumf %5, %6 : vector<8x256xf32>
    %cst_6 = arith.constant dense<0.000000e+00> : vector<256xf32>
    %8 = vector.multi_reduction <add>, %7, %cst_6 [0] : vector<8x256xf32> to vector<256xf32>
    %9 = vector.shape_cast %8 : vector<256xf32> to vector<1x256xf32>
    %cst_7 = arith.constant 8.000000e+00 : f32
    %10 = vector.broadcast %cst_7 : f32 to vector<1x256xf32>
    %11 = arith.divf %9, %10 : vector<1x256xf32>
    %12 = vector.broadcast %11 : vector<1x256xf32> to vector<8x256xf32>
    %13 = arith.subf %7, %12 : vector<8x256xf32>
    %14 = arith.mulf %13, %13 : vector<8x256xf32>
    %cst_8 = arith.constant dense<0.000000e+00> : vector<256xf32>
    %15 = vector.multi_reduction <add>, %14, %cst_8 [0] : vector<8x256xf32> to vector<256xf32>
    %16 = vector.shape_cast %15 : vector<256xf32> to vector<1x256xf32>
    %cst_9 = arith.constant 8.000000e+00 : f32
    %17 = vector.broadcast %cst_9 : f32 to vector<1x256xf32>
    %18 = arith.divf %16, %17 : vector<1x256xf32>
    %cst_10 = arith.constant 9.99999974E-6 : f32
    %19 = vector.broadcast %cst_10 : f32 to vector<1x256xf32>
    %20 = arith.addf %18, %19 : vector<1x256xf32>
    %21 = math.rsqrt %20 : vector<1x256xf32>
    %22 = vector.broadcast %21 : vector<1x256xf32> to vector<8x256xf32>
    %23 = arith.mulf %13, %22 : vector<8x256xf32>
    %c1 = arith.constant 1 : index
    %c0_11 = arith.constant 0 : index
    %24 = vector.load %arg3[%c1, %c0_11] : memref<4x256xf32, #tpu.memory_space<vmem>>, vector<1x256xf32>
    %25 = vector.broadcast %24 : vector<1x256xf32> to vector<8x256xf32>
    %26 = arith.mulf %23, %25 : vector<8x256xf32>
    %c2 = arith.constant 2 : index
    %c0_12 = arith.constant 0 : index
    %27 = vector.load %arg3[%c2, %c0_12] : memref<4x256xf32, #tpu.memory_space<vmem>>, vector<1x256xf32>
    %28 = vector.broadcast %27 : vector<1x256xf32> to vector<8x256xf32>
    %29 = arith.addf %26, %28 : vector<8x256xf32>
    %30 = vector.extract_strided_slice %29 {offsets = [0, 0], sizes = [8, 128], strides = [1, 1]} : vector<8x256xf32> to vector<8x128xf32>
    %c0_13 = arith.constant 0 : index
    %c0_14 = arith.constant 0 : index
    %c0_15 = arith.constant 0 : index
    %31 = vector.load %arg2[%c0_13, %c0_14, %c0_15] : memref<2x128x16xf32, #tpu.memory_space<vmem>>, vector<1x128x16xf32>
    %32 = vector.shape_cast %31 : vector<1x128x16xf32> to vector<128x16xf32>
    %cst_16 = arith.constant dense<0.000000e+00> : vector<8x16xf32>
    %33 = tpu.matmul %30, %32, %cst_16 {dimension_numbers = #tpu.dot_dimension_numbers<[1], [0], [0], [1], [0, 0, 1, 1], [], []>} : vector<8x128xf32>, vector<128x16xf32>, vector<8x16xf32> -> vector<8x16xf32>
    %c3 = arith.constant 3 : index
    %c0_17 = arith.constant 0 : index
    %34 = vector.load %arg3[%c3, %c0_17] : memref<4x256xf32, #tpu.memory_space<vmem>>, vector<1x16xf32>
    %35 = vector.broadcast %34 : vector<1x16xf32> to vector<8x16xf32>
    %36 = arith.addf %33, %35 : vector<8x16xf32>
    %c0_18 = arith.constant 0 : index
    %c0_19 = arith.constant 0 : index
    %37 = vector.load %arg4[%c0_18, %c0_19] : memref<8x16xf32, #tpu.memory_space<vmem>>, vector<8x16xf32>
    tpu.vector_store %arg4[%c0_18, %c0_19], %36 {strides = array<i32>} : memref<8x16xf32, #tpu.memory_space<vmem>>, vector<8x16xf32>,
    %38 = vector.extract_strided_slice %29 {offsets = [0, 128], sizes = [8, 128], strides = [1, 1]} : vector<8x256xf32> to vector<8x128xf32>
    %c1_20 = arith.constant 1 : index
    %c0_21 = arith.constant 0 : index
    %c0_22 = arith.constant 0 : index
    %39 = vector.load %arg2[%c1_20, %c0_21, %c0_22] : memref<2x128x16xf32, #tpu.memory_space<vmem>>, vector<1x128x16xf32>
    %40 = vector.shape_cast %39 : vector<1x128x16xf32> to vector<128x16xf32>
    %cst_23 = arith.constant dense<0.000000e+00> : vector<8x16xf32>
    %41 = tpu.matmul %38, %40, %cst_23 {dimension_numbers = #tpu.dot_dimension_numbers<[1], [0], [0], [1], [0, 0, 1, 1], [], []>} : vector<8x128xf32>, vector<128x16xf32>, vector<8x16xf32> -> vector<8x16xf32>
    %c3_24 = arith.constant 3 : index
    %c128 = arith.constant 128 : index
    %42 = vector.load %arg3[%c3_24, %c128] : memref<4x256xf32, #tpu.memory_space<vmem>>, vector<1x16xf32>
    %43 = vector.broadcast %42 : vector<1x16xf32> to vector<8x16xf32>
    %44 = arith.addf %41, %43 : vector<8x16xf32>
    %cst_25 = arith.constant 2.000000e+01 : f32
    %45 = vector.broadcast %cst_25 : f32 to vector<8x16xf32>
    %46 = arith.cmpf ogt, %44, %45 : vector<8x16xf32>
    %cst_26 = arith.constant 2.000000e+01 : f32
    %47 = vector.broadcast %cst_26 : f32 to vector<8x16xf32>
    %48 = arith.minimumf %44, %47 : vector<8x16xf32>
    %49 = math.exp %48 : vector<8x16xf32>
    %50 = math.log1p %49 : vector<8x16xf32>
    %51 = arith.select %46, %44, %50 : vector<8x16xi1>, vector<8x16xf32>
    %c0_27 = arith.constant 0 : index
    %c0_28 = arith.constant 0 : index
    %52 = vector.load %arg5[%c0_27, %c0_28] : memref<8x16xf32, #tpu.memory_space<vmem>>, vector<8x16xf32>
    tpu.vector_store %arg5[%c0_27, %c0_28], %51 {strides = array<i32>} : memref<8x16xf32, #tpu.memory_space<vmem>>, vector<8x16xf32>,
    return
  }
}

</mosaic_0001>

<bundles_post_ra>
// kernel: action_conditioned_vector_decoder_forward.1
= control target key start
LH: loop header
LB: loop body
LE: loop exit
PB: predicated region body
PF: predicated region fallthrough
CT: control target
= control target key end

     0   :  { %11 = vsyncpa [#allocation3], 0  ;;  %v666_v7 = vmov 0.0   ;;  %s896_s0 = inlined_call_operand.vmem [shape: f32[8,48], index: 0, kind: input, shape index: {}]   ;;  %s897_s1 = inlined_call_operand.vmem [shape: f32[48,256], index: 1, kind: input, shape index: {}]   ;;  %s898_s2 = inlined_call_operand.vmem [shape: f32[2,128,16], index: 2, kind: input, shape index: {}]   ;;  %s899_s3 = inlined_call_operand.vmem [shape: f32[4,256], index: 3, kind: input, shape index: {}]   ;;  %s900_s4 = inlined_call_operand.hbm [shape: f32[8,16], index: 4, kind: output, shape index: {0}]   ;;  %s901_s5 = inlined_call_operand.hbm [shape: f32[8,16], index: 5, kind: output, shape index: {1}]  }
   0x1   :  { %v23_v0 = vld [vmem:[%s897_s1 + $0x8] sm:$0xff]  ;;  %v25_v1 = vld [vmem:[%s897_s1 + $0x18] sm:$0xff]  ;;  %v22_v2 = vld [vmem:[%s897_s1] sm:$0xff]  ;;  %114 = vmatprep.mubr.f32.mxu0 %v666_v7 }
   0x2   :  { %v545_v3 = vpack.c.bf16 %v25_v1, %v23_v0  ;;  %v24_v4 = vld [vmem:[%s897_s1 + $0x10] sm:$0xff]  ;;  %v27_v5 = vld [vmem:[%s897_s1 + $0x28] sm:$0xff]  ;;  %v29_v6 = vld [vmem:[%s897_s1 + $0x38] sm:$0xff] }
   0x3   :  { %v547_v8 = vpack.c.bf16 %v24_v4, %v22_v2  ;;  %v549_v9 = vpack.c.bf16 %v29_v6, %v27_v5  ;;  %v26_v10 = vld [vmem:[%s897_s1 + $0x20] sm:$0xff]  ;;  %v28_v11 = vld [vmem:[%s897_s1 + $0x30] sm:$0xff]  ;;  %v31_v12 = vld [vmem:[%s897_s1 + $0x48] sm:$0xff] }
   0x4   :  { %546 = vmatprep.subr.bf16.mxu0 %v545_v3  ;;  %v33_v13 = vld [vmem:[%s897_s1 + $0x58] sm:$0xff]  ;;  %v551_v14 = vpack.c.bf16 %v28_v11, %v26_v10  ;;  %v30_v16 = vld [vmem:[%s897_s1 + $0x40] sm:$0xff]  ;;  %v32_v17 = vld [vmem:[%s897_s1 + $0x50] sm:$0xff] }
   0x5   :  { %548 = vmatpush1.bf16.msra.mxu0 %v547_v8  ;;  %v553_v15 = vpack.c.bf16 %v33_v13, %v31_v12 }
   0x6   :  { %550 = vmatprep.subr.bf16.mxu0 %v549_v9 }
   0x7   :  { %12 = vsyncpa [#allocation5], 0  ;;  %v555_v18 = vpack.c.bf16 %v32_v17, %v30_v16  ;;  %v21_v19 = vld [vmem:[%s896_s0] sm:$0xff]  ;;  %vm46_vm0 = vcmask 392192   ;;  %v193_v21 = vld [vmem:[%s898_s2 + $0x8] sm:$0xff]  ;;  %v667_v25 = vmov 0.0|0.0   ;;  %v36_v5 = vlaneseq }
   0x8   :  { %v192_v20 = vld [vmem:[%s898_s2] sm:$0xff]  ;;  %v425_v24 = vld [vmem:[%s898_s2 + $0x88] sm:$0xff]  ;;  %557 = vmatprep.subr.bf16.mxu1 %v667_v25  ;;  %v194_v27 = vld [vmem:[%s898_s2 + $0x10] sm:$0xff]  ;;  %vm668_vm1 = vmmov 0   ;;  %s669_s9 = smov [#allocation2]   ;;  %vm283_vm2 = vcmask 130048  }
   0x9   :  { %552 = vmatpush1.bf16.msra.mxu0 %v551_v14  ;;  %v558_v22 = vpack.c.bf16 %v193_v21, %v192_v20  ;;  %v424_v23 = vld [vmem:[%s898_s2 + $0x80] sm:$0xff]  ;;  %v195_v28 = vld [vmem:[%s898_s2 + $0x18] sm:$0xff]  ;;  %v426_v30 = vld [vmem:[%s898_s2 + $0x90] sm:$0xff]  ;;  %507 = vmatprep.mubr.msk.f32.mxu1 %vm668_vm1, %v666_v7  ;;  %v37_v6 = vshrl.u32 %v36_v5, 7  ;;  %s398_s10 = sshll.u32 %s669_s9, 4  ;;  %s399_s10 = int_to_ptr.vmem [resolvable:$true] %s398_s10 }
   0xa   :  { %554 = vmatprep.subr.bf16.mxu0 %v553_v15  ;;  %v582_v26 = vpack.c.bf16 %v425_v24, %v424_v23  ;;  %v561_v29 = vpack.c.bf16 %v195_v28, %v194_v27  ;;  %v427_v31 = vld [vmem:[%s898_s2 + $0x98] sm:$0xff]  ;;  %v196_v33 = vld [vmem:[%s898_s2 + $0x20] sm:$0xff]  ;;  %v197_v34 = vld [vmem:[%s898_s2 + $0x28] sm:$0xff]  ;;  %s618_s13 = scalar_lea.vmem %s399_s10, 128  ;;  %p623_p1 = scmp.lt.s32.totalorder %s399_s10, %s399_s10 }
   0xb   :  { %559 = vmatpush3.bf16.msra.mxu1 %v558_v22  ;;  %v585_v32 = vpack.c.bf16 %v427_v31, %v426_v30  ;;  %v564_v35 = vpack.c.bf16 %v197_v34, %v196_v33  ;;  %v428_v36 = vld [vmem:[%s898_s2 + $0xa0] sm:$0xff]  ;;  %v429_v37 = vld [vmem:[%s898_s2 + $0xa8] sm:$0xff]  ;;  %v198_v39 = vld [vmem:[%s898_s2 + $0x30] sm:$0xff]  ;;  %v38_v8 = vsub.s32 0, %v37_v6  ;;  %v42_v10 = vsub.s32 1, %v37_v6  ;;  %p619_p0 = scmp.ne.s32.totalorder %s399_s10, %s618_s13  ;;  %p624_p2 = scmp.lt.s32.totalorder %s618_s13, %s618_s13 }
   0xc   :  { %560 = vmatprep.subr.bf16.mxu1 %v667_v25  ;;  %v588_v38 = vpack.c.bf16 %v429_v37, %v428_v36  ;;  %v199_v40 = vld [vmem:[%s898_s2 + $0x38] sm:$0xff]  ;;  %v430_v42 = vld [vmem:[%s898_s2 + $0xb0] sm:$0xff]  ;;  %v200_v45 = vld [vmem:[%s898_s2 + $0x40] sm:$0xff] }
   0xd   :  { %556 = vmatpush1.bf16.msra.mxu0 %v555_v18  ;;  %v567_v41 = vpack.c.bf16 %v199_v40, %v198_v39  ;;  %v431_v43 = vld [vmem:[%s898_s2 + $0xb8] sm:$0xff]  ;;  %v201_v46 = vld [vmem:[%s898_s2 + $0x48] sm:$0xff]  ;;  %v432_v48 = vld [vmem:[%s898_s2 + $0xc0] sm:$0xff]  ;;  %p625_p3 = por %p624_p2, %p623_p1 }
   0xe   :  { %581 = vmatprep.subr.bf16.mxu0 %v667_v25  ;;  %v591_v44 = vpack.c.bf16 %v431_v43, %v430_v42  ;;  %v570_v47 = vpack.c.bf16 %v201_v46, %v200_v45  ;;  %v433_v49 = vld [vmem:[%s898_s2 + $0xc8] sm:$0xff]  ;;  %v202_v51 = vld [vmem:[%s898_s2 + $0x50] sm:$0xff]  ;;  %v203_v52 = vld [vmem:[%s898_s2 + $0x58] sm:$0xff] }
   0xf   :  { %562 = vmatpush3.bf16.msra.mxu1 %v561_v29  ;;  %v594_v50 = vpack.c.bf16 %v433_v49, %v432_v48  ;;  %v573_v53 = vpack.c.bf16 %v203_v52, %v202_v51  ;;  %v434_v54 = vld [vmem:[%s898_s2 + $0xd0] sm:$0xff]  ;;  %v435_v55 = vld [vmem:[%s898_s2 + $0xd8] sm:$0xff]  ;;  %v204_v57 = vld [vmem:[%s898_s2 + $0x60] sm:$0xff]  ;;  %p626_p4 = pnand %p625_p3, %p619_p0 }
  0x10   :  { %420 = vmatmul.mubr.msk.f32.vlgmr.msra.gmra.mrb[0].mxu0 %vm46_vm0, %v21_v19  ;;  %563 = vmatprep.subr.bf16.mxu1 %v667_v25  ;;  %v597_v56 = vpack.c.bf16 %v435_v55, %v434_v54  ;;  %v205_v58 = vld [vmem:[%s898_s2 + $0x68] sm:$0xff]  ;;  %v436_v60 = vld [vmem:[%s898_s2 + $0xe0] sm:$0xff]  ;;  %v206_v63 = vld [vmem:[%s898_s2 + $0x70] sm:$0xff] }
  0x11   :  { %583 = vmatpush3.bf16.msra.mxu0 %v582_v26  ;;  %v576_v59 = vpack.c.bf16 %v205_v58, %v204_v57  ;;  %v437_v61 = vld [vmem:[%s898_s2 + $0xe8] sm:$0xff]  ;;  %v207_v0 = vld [vmem:[%s898_s2 + $0x78] sm:$0xff]  ;;  %v438_v2 = vld [vmem:[%s898_s2 + $0xf0] sm:$0xff]  ;;  %542 = vmatprep.mubr.msk.f32.mxu0 %vm668_vm1, %v666_v7 }
  0x12   :  { %584 = vmatprep.subr.bf16.mxu0 %v667_v25  ;;  %v600_v62 = vpack.c.bf16 %v437_v61, %v436_v60  ;;  %v579_v1 = vpack.c.bf16 %v207_v0, %v206_v63  ;;  %v439_v3 = vld [vmem:[%s898_s2 + $0xf8] sm:$0xff]  ;;  %v34_v9 = vld [vmem:[%s899_s3] ss:$4 sm:$0x3] }
  0x13   :  { %565 = vmatpush3.bf16.msra.mxu1 %v564_v35  ;;  %v603_v4 = vpack.c.bf16 %v439_v3, %v438_v2  ;;  %v39_v11 = vrot.slane %v34_v9, %v38_v8  ;;  %v43_v12 = vrot.slane %v34_v9, %v42_v10  ;;  %v421_v52 = vld [vmem:[%s899_s3 + $0x1] ss:$4 sm:$0x3]  ;;  %v423_v2 = vld [vmem:[%s899_s3 + $0x3] ss:$0 sm:$0xff] }
  0x14   :  { %566 = vmatprep.subr.bf16.mxu1 %v667_v25  ;;  %v168_v54 = vrot.slane %v421_v52, %v38_v8  ;;  %v440_v3 = vld [vmem:[%s899_s3 + $0x7] ss:$0 sm:$0xff] }
  0x15   :  { %586 = vmatpush3.bf16.msra.mxu0 %v585_v32 }
  0x16   :  { %587 = vmatprep.subr.bf16.mxu0 %v667_v25 }
  0x17   :  { %568 = vmatpush3.bf16.msra.mxu1 %v567_v41 }
  0x18   :  { %569 = vmatprep.subr.bf16.mxu1 %v667_v25 }
  0x19   :  { %589 = vmatpush3.bf16.msra.mxu0 %v588_v38 }
  0x1a   :  { %590 = vmatprep.subr.bf16.mxu0 %v667_v25 }
  0x1b   :  { %571 = vmatpush3.bf16.msra.mxu1 %v570_v47 }
  0x1c   :  { %572 = vmatprep.subr.bf16.mxu1 %v667_v25 }
  0x1d   :  { %592 = vmatpush3.bf16.msra.mxu0 %v591_v44 }
  0x1e   :  { %593 = vmatprep.subr.bf16.mxu0 %v667_v25 }
  0x1f   :  { %574 = vmatpush3.bf16.msra.mxu1 %v573_v53  ;;  %v422_v53 = vld [vmem:[%s899_s3 + $0x2] ss:$4 sm:$0x3] }
  0x20   :  { %575 = vmatprep.subr.bf16.mxu1 %v667_v25  ;;  %v187_v61 = vrot.slane %v422_v53, %v42_v10 }
  0x21   :  { %595 = vmatpush3.bf16.msra.mxu0 %v594_v50 }
  0x22   :  { %596 = vmatprep.subr.bf16.mxu0 %v667_v25 }
  0x23   :  { %577 = vmatpush3.bf16.msra.mxu1 %v576_v59  ;;  %v183_v59 = vrot.slane %v422_v53, %v38_v8 }
  0x24   :  { %578 = vmatprep.subr.bf16.mxu1 %v667_v25 }
  0x25   :  { %598 = vmatpush3.bf16.msra.mxu0 %v597_v56  ;;  %v172_v56 = vrot.slane %v421_v52, %v42_v10 }
  0x26   :  { %599 = vmatprep.subr.bf16.mxu0 %v667_v25 }
  0x27   :  { %580 = vmatpush3.bf16.msra.mxu1 %v579_v1 }
  0x29   :  { %601 = vmatpush3.bf16.msra.mxu0 %v600_v62 }
  0x2a   :  { %602 = vmatprep.subr.bf16.mxu0 %v667_v25 }
  0x2d   :  { %604 = vmatpush3.bf16.msra.mxu0 %v603_v4 }
  0xe3   :  { %v116_v13 = vpop.f32.mrb[0].mxu0 }
  0xe4   :  { %v117_v14 = vadd.f32 %v116_v13, %v39_v11  ;;  %v118_v15 = vpop.f32.mrb[1].mxu0 }
  0xe5   :  { %v119_v16 = vadd.f32 %v118_v15, %v43_v12 }
  0xe6   :  { %v121_v17 = vmax.f32 %v117_v14, 0.0 }
  0xe7   :  { %v122_v18 = vmax.f32 %v119_v16, 0.0 }
  0xe8   :  { %v123_v19 = vrot.slane %v121_v17, 4 }
  0xe9   :  { %v129_v7 = vrot.slane %v122_v18, 4 }
  0xea   :  { %v124_v20 = vadd.f32 %v123_v19, %v121_v17 }
  0xeb   :  { %v130_v21 = vadd.f32 %v129_v7, %v122_v18 }
  0xec   :  { %v125_v22 = vrot.slane %v124_v20, 2 }
  0xed   :  { %v131_v23 = vrot.slane %v130_v21, 2 }
  0xee   :  { %v126_v24 = vadd.f32 %v125_v22, %v124_v20 }
  0xef   :  { %v132_v25 = vadd.f32 %v131_v23, %v130_v21 }
  0xf0   :  { %v127_v26 = vrot.slane %v126_v24, 1 }
  0xf1   :  { %v133_v27 = vrot.slane %v132_v25, 1 }
  0xf2   :  { %v128_v28 = vadd.f32 %v127_v26, %v126_v24 }
  0xf3   :  { %v134_v29 = vadd.f32 %v133_v27, %v132_v25 }
  0xf4   :  { %v136_v30 = vmul.f32 0.125, %v128_v28 }
  0xf5   :  { %v137_v31 = vmul.f32 0.125, %v134_v29 }
  0xf6   :  { %v138_v32 = vsub.f32 %v121_v17, %v136_v30 }
  0xf7   :  { %v139_v33 = vsub.f32 %v122_v18, %v137_v31 }
  0xf8   :  { %v140_v34 = vmul.f32 %v138_v32, %v138_v32 }
  0xf9   :  { %v141_v35 = vmul.f32 %v139_v33, %v139_v33 }
  0xfa   :  { %v142_v36 = vrot.slane %v140_v34, 4 }
  0xfb   :  { %v148_v37 = vrot.slane %v141_v35, 4 }
  0xfc   :  { %v143_v38 = vadd.f32 %v142_v36, %v140_v34 }
  0xfd   :  { %v149_v39 = vadd.f32 %v148_v37, %v141_v35 }
  0xfe   :  { %v144_v40 = vrot.slane %v143_v38, 2 }
  0xff   :  { %v150_v41 = vrot.slane %v149_v39, 2 }
 0x100   :  { %v145_v42 = vadd.f32 %v144_v40, %v143_v38 }
 0x101   :  { %v151_v43 = vadd.f32 %v150_v41, %v149_v39 }
 0x102   :  { %v146_v44 = vrot.slane %v145_v42, 1 }
 0x103   :  { %v152_v45 = vrot.slane %v151_v43, 1 }
 0x104   :  { %v147_v46 = vadd.f32 %v146_v44, %v145_v42 }
 0x105   :  { %v153_v47 = vadd.f32 %v152_v45, %v151_v43 }
 0x106   :  { %v154_v48 = vmul.f32 0.125, %v147_v46 }
 0x107   :  { %v155_v49 = vmul.f32 0.125, %v153_v47 }
 0x108   :  { %v156_v50 = vadd.f32 1e-05, %v154_v48 }
 0x109   :  { %v157_v51 = vadd.f32 1e-05, %v155_v49 }
 0x10a   :  { %610 = vrsqrt.f32 %v156_v50 }
 0x10b   :  { %612 = vrsqrt.f32 %v157_v51 }
 0x114   :  { %v611_v55 = vpop.eup %610 }
 0x115   :  { %v613_v57 = vpop.eup %612  ;;  %v160_v58 = vmul.f32 %v611_v55, %v138_v32 }
 0x116   :  { %v161_v60 = vmul.f32 %v613_v57, %v139_v33 }
 0x117   :  { %v175_v62 = vmul.f32 %v168_v54, %v160_v58 }
 0x118   :  { %v176_v63 = vmul.f32 %v172_v56, %v161_v60 }
 0x119   :  { %v190_v0 = vadd.f32 %v183_v59, %v175_v62 }
 0x11a   :  { %v191_v1 = vadd.f32 %v187_v61, %v176_v63 }
 0x11b   :  { %508 = vmatmul.mubr.f32.vlgmr.msra.gmra.mrb[0].mxu1 %v190_v0 }
 0x11c   :  { %543 = vmatmul.mubr.f32.vlgmr.msra.gmra.mrb[2].mxu0 %v191_v1 }
 0x1ee   :  { %v279_v4 = vpop.f32.mrb[0].mxu1 }
 0x1ef   :  { %v280_v5 = vadd.f32 %v423_v2, %v279_v4  ;;  %v509_v6 = vpop.f32.mrb[1].mxu1  ;;  %v373_v8 = vpop.f32.mrb[2].mxu0 }
 0x1f0   :  { %v374_v9 = vadd.f32 %v440_v3, %v373_v8  ;;  %v544_v10 = vpop.f32.mrb[3].mxu0 }
 0x1f1   :  { %284 = vst.msk [vmem:[#allocation2] sm:$0xff] %vm283_vm2, %v280_v5 }
 0x1f2   :  { %v378_v11 = vmin.f32 %v374_v9, 20.0 }
 0x1f3   :  { %629 = shalt.err (!%p626_p4)
}
 0x1f4   :  { %s630_s15 = scalar_lea.hbm %s900_s4, 128 }
 0x1f5   :  { %p631_p5 = scmp.ne.s32.totalorder %s900_s4, %s630_s15  ;;  %p634_p6 = scmp.lt.u32.totalorder %s630_s15, %s900_s4 }
 0x1f7   :  { %p636_p7 = pnand %p634_p6, %p631_p5 }
 0x1f9   :  { %639 = shalt.err (!%p636_p7)
}
 0x1fa   :  { %401 = dma.vmem_to_hbm [thread:$0]  %s399_s10, 128, %s900_s4, [#allocation3]   ;;  %v379_v12 = vmul.f32 1.442695, %v378_v11  ;;  %vm377_vm4 = vcmp.gt.f32.partialorder %v374_v9, 20.0 }
 0x1fb   :  { %s670_s22 = smov [#allocation4]  }
 0x1fc   :  { %614 = vpow2.f32 %v379_v12  ;;  %s408_s1 = sshll.u32 %s670_s22, 4  ;;  %s409_s1 = int_to_ptr.vmem [resolvable:$true] %s408_s1 }
 0x1fd   :  { %s640_s4 = scalar_lea.vmem %s409_s1, 128  ;;  %p645_p9 = scmp.lt.s32.totalorder %s409_s1, %s409_s1 }
 0x1fe   :  { %p641_p8 = scmp.ne.s32.totalorder %s409_s1, %s640_s4  ;;  %p646_p10 = scmp.lt.s32.totalorder %s640_s4, %s640_s4 }
 0x200   :  { %p647_p11 = por %p646_p10, %p645_p9 }
 0x202   :  { %p648_p12 = pnand %p647_p11, %p641_p8 }
 0x206   :  { %v615_v13 = vpop.eup %614 }
 0x207   :  { %v381_v14 = vadd.f32 1.0, %v615_v13  ;;  %v384_v15 = vmul.f32 -0.5, %v615_v13  ;;  %v387_v17 = vand.u32 2147483647, %v615_v13 }
 0x209   :  { %616 = vlog2.f32 %v381_v14  ;;  %v385_v16 = vadd.f32 1.0, %v384_v15  ;;  %vm388_vm3 = vcmp.lt.f32.partialorder %v387_v17, 0.0004427343 }
 0x20b   :  { %v386_v7 = vmul.f32 %v615_v13, %v385_v16 }
 0x213   :  { %v617_v18 = vpop.eup %616 }
 0x214   :  { %v383_v19 = vmul.f32 0.6931472, %v617_v18 }
 0x216   :  { %v389_v20 = vsel %vm388_vm3, %v386_v7, %v383_v19 }
 0x217   :  { %v390_v21 = vsel %vm377_vm4, %v374_v9, %v389_v20 }
 0x218   :  { %391 = vst.msk [vmem:[#allocation4] sm:$0xff] %vm283_vm2, %v390_v21 }
 0x219   :  { %651 = shalt.err (!%p648_p12)
}
 0x21a   :  { %s652_s25 = scalar_lea.hbm %s901_s5, 128 }
 0x21b   :  { %p653_p13 = scmp.ne.s32.totalorder %s901_s5, %s652_s25  ;;  %p656_p0 = scmp.lt.u32.totalorder %s652_s25, %s901_s5 }
 0x21d   :  { %p658_p1 = pnand %p656_p0, %p653_p13 }
 0x21f   :  { %661 = shalt.err (!%p658_p1)
}
 0x220   :  { %411 = dma.vmem_to_hbm [thread:$0]  %s409_s1, 128, %s901_s5, [#allocation5]  }
 0x221   :  { %662 = dma.done.wait [#allocation3], 128  }
 0x222   :  { %663 = vsyncadd [#allocation3], 4294967168 }
 0x223   :  { %664 = dma.done.wait [#allocation5], 128  }
 0x224   :  { %665 = vsyncadd [#allocation5], 4294967168 }
 0x225   :  { %418 = vsyncpa [#allocation3], 1 }
 0x226   :  { %419 = vsyncpa [#allocation5], 1 }

</bundles_post_ra>
